<compile_context>
chip_gen: v7x
topology: tpu7x:2x2x1
jax: 0.10.0
libtpu: 0.0.40
codegen_flags: <defaults>
</compile_context>

<pallas_src>
import functools

import jax
import jax.numpy as jnp
from jax.experimental import pallas as pl
from jax.experimental.pallas import tpu as pltpu


def _patch_embed_kernel(patches_ref, w_ref, pos_ref, cls_ref, out_ref):
    # patches_ref: (bt, N_pad, K)  compute dtype (bf16), N_pad % 8 == 0
    # w_ref      : (K, E)          compute dtype, resident across the grid
    # pos_ref    : (N, E)  f32     positions[1:] + conv bias, resident
    # cls_ref    : (1, E)  f32     cls_token + positions[0],  resident
    # out_ref    : (bt, N + 1, E)
    bt, n_pad, k = patches_ref.shape
    n = out_ref.shape[1] - 1
    e = w_ref.shape[1]

    # One large MXU matmul per grid step; the leading-dim collapse is a layout
    # no-op because N_pad is a multiple of the sublane tile (8).
    proj = jnp.dot(
        patches_ref[...].reshape(bt * n_pad, k),
        w_ref[...],
        preferred_element_type=jnp.float32,
    ).reshape(bt, n_pad, e)                      # (bt, N_pad, E) f32
    if n_pad != n:
        proj = proj[:, :n, :]                    # drop zero-padded patch rows

    # Vectorized epilogue: two batched stores, no per-image loop.
    out_ref[:, 0:1, :] = jnp.broadcast_to(
        cls_ref[...].astype(out_ref.dtype), (bt, 1, e))
    out_ref[:, 1:, :] = (proj + pos_ref[...][None]).astype(out_ref.dtype)


def _vmem_capacity_bytes():
    """Best-effort chip VMEM capacity (falls back to the 64 MiB v7x floor)."""
    try:
        return int(pltpu.get_tpu_info().vmem_capacity_bytes)
    except Exception:  # non-TPU trace / older runtime
        return 64 * 1024 * 1024


def _pick_block_b(B, n_pad, n, k, e, in_bytes, out_bytes, block_budget):
    """Largest divisor of B that fits the VMEM budget and keeps grid >= 2."""

    def per_step_bytes(bb):
        return (
            2 * bb * n_pad * k * in_bytes          # patches (double-buffered)
            + 2 * bb * (n + 1) * e * out_bytes     # output  (double-buffered)
            + 2 * k * e * in_bytes                 # resident weight
            + 2 * n * e * 4 + 2 * e * 4            # resident pos + cls (f32)
            + 2 * bb * n_pad * e * 4               # f32 proj + epilogue temps
        )

    divisors = [d for d in range(1, B + 1) if B % d == 0]
    fitting = [d for d in divisors if per_step_bytes(d) <= block_budget]
    if not fitting:
        return 1                                   # degrade gracefully
    # Prefer grid length >= 2 (v7x has 2 TensorCores per chip); within that,
    # take the largest block: maximizes MXU M per step (toward the 256-wide
    # pass) and amortizes the ~0.35 us per-grid-step pipeline overhead.
    two_core = [d for d in fitting if B // d >= 2]
    candidates = two_core if two_core else fitting
    return max(candidates)


def patch_embedding_forward(x, conv_w, conv_b, cls_token, positions, *,
                            patch_size, block_b=None,
                            compute_dtype=jnp.bfloat16, out_dtype=None):
    """x: (B, C, H, W) NCHW float32. Returns (B, N+1, E) in out_dtype (default x.dtype)."""
    B, C, H, W = x.shape
    P = patch_size
    E = conv_w.shape[0]
    hN, wN = H // P, W // P
    N = hN * wN
    K = C * P * P
    out_dtype = x.dtype if out_dtype is None else out_dtype

    # --- glue: space-to-depth patch extraction, flattened in (C, ph, pw)
    # order to match PyTorch's OIHW weight flattening; emitted directly in
    # bf16 so the materialized intermediate is half-width in HBM.
    # NOTE: for best MXU/store efficiency use lane-aligned E (and K), i.e.
    # multiples of 128; padding them here would cost an extra HBM pass over
    # the output, so it is left to the caller's model dimensions.
    patches = x.reshape(B, C, hN, P, wN, P)
    patches = jnp.transpose(patches, (0, 2, 4, 1, 3, 5))   # (B, hN, wN, C, P, P)
    patches = patches.reshape(B, N, K).astype(compute_dtype)

    # Pad N to a multiple of the sublane tile so the kernel always runs a
    # single (block_b*N_pad, K) matmul (no per-image fallback).
    N_pad = ((N + 7) // 8) * 8
    if N_pad != N:
        patches = jnp.pad(patches, ((0, 0), (0, N_pad - N), (0, 0)))

    w_t = conv_w.reshape(E, K).T.astype(compute_dtype)                 # (K, E)
    pos_bias = (positions[1:] + conv_b[None, :]).astype(jnp.float32)   # (N, E)
    cls_row = (cls_token.reshape(1, E) + positions[0:1]).astype(jnp.float32)

    in_b = jnp.dtype(compute_dtype).itemsize
    out_b = jnp.dtype(out_dtype).itemsize
    vmem_cap = _vmem_capacity_bytes()
    # ~3/8 of physical VMEM for the pipelined working set (48 MiB on 128 MiB
    # v5e/v6e, 24 MiB on 64 MiB v7x); cap the compiler at ~3/4 of physical.
    block_budget = (vmem_cap * 3) // 8
    vmem_limit = (vmem_cap * 3) // 4

    if block_b is None:
        block_b = _pick_block_b(B, N_pad, N, K, E, in_b, out_b, block_budget)
    assert B % block_b == 0, (B, block_b)

    out = pl.pallas_call(
        _patch_embed_kernel,
        out_shape=jax.ShapeDtypeStruct((B, N + 1, E), out_dtype),
        grid_spec=pltpu.PrefetchScalarGridSpec(
            num_scalar_prefetch=0,
            grid=(B // block_b,),
            in_specs=[
                pl.BlockSpec((block_b, N_pad, K), lambda i: (i, 0, 0)),
                pl.BlockSpec((K, E), lambda i: (0, 0)),      # resident weight
                pl.BlockSpec((N, E), lambda i: (0, 0)),      # resident pos+bias
                pl.BlockSpec((1, E), lambda i: (0, 0)),      # resident cls row
            ],
            out_specs=pl.BlockSpec((block_b, N + 1, E), lambda i: (i, 0, 0)),
        ),
        compiler_params=pltpu.CompilerParams(
            dimension_semantics=("parallel",),
            vmem_limit_bytes=vmem_limit,
        ),
    )(patches, w_t, pos_bias, cls_row)
    return out


def _reference_forward(x, conv_w, conv_b, cls_token, positions, patch_size):
    """Pure-JAX f32 reference (lax conv) mirroring the PyTorch module."""
    B = x.shape[0]
    E = conv_w.shape[0]
    y = jax.lax.conv_general_dilated(
        x, conv_w,
        window_strides=(patch_size, patch_size),
        padding="VALID",
        dimension_numbers=("NCHW", "OIHW", "NCHW"),
        precision=jax.lax.Precision.HIGHEST,
    ) + conv_b.reshape(1, E, 1, 1)
    Bn, Ee, hN, wN = y.shape
    y = y.reshape(Bn, Ee, hN * wN).transpose(0, 2, 1)   # b e h w -> b (h w) e
    cls = jnp.broadcast_to(cls_token, (B, 1, E))
    y = jnp.concatenate([cls, y], axis=1)
    return y + positions[None, :, :]


if __name__ == "__main__":
    in_channels = 4
    patch_size = 4
    emb_size = 32
    img_size = 16
    batch = 4                                     # auto block_b -> 2, grid of 2
    num_patches = (img_size // patch_size) ** 2   # 16

    key = jax.random.PRNGKey(0)
    kx, kw, kb, kc, kp = jax.random.split(key, 5)

    x = jax.random.normal(kx, (batch, in_channels, img_size, img_size), jnp.float32)
    conv_w = jax.random.normal(
        kw, (emb_size, in_channels, patch_size, patch_size), jnp.float32) * 0.05
    conv_b = jax.random.normal(kb, (emb_size,), jnp.float32) * 0.05
    cls_token = jax.random.normal(kc, (1, 1, emb_size), jnp.float32)
    positions = jax.random.normal(kp, (num_patches + 1, emb_size), jnp.float32)

    fwd = jax.jit(functools.partial(patch_embedding_forward, patch_size=patch_size))
    out = jax.block_until_ready(fwd(x, conv_w, conv_b, cls_token, positions))

    ref = _reference_forward(x, conv_w, conv_b, cls_token, positions, patch_size)
    assert out.shape == (batch, num_patches + 1, emb_size), out.shape
    # bf16 MXU inputs vs f32 reference -> ~1e-2-level agreement expected.
    assert jnp.allclose(out, ref, atol=3e-2, rtol=3e-2), (
        float(jnp.max(jnp.abs(out - ref))))

    print("KERNEL_OK")
</pallas_src>

<mosaic_0001>
module attributes {stable_mosaic.version = 11 : i64} {
  func.func @_patch_embed_kernel(%arg0: i32, %arg1: memref<2x16x64xbf16, #tpu.memory_space<vmem>>, %arg2: memref<64x32xbf16, #tpu.memory_space<vmem>>, %arg3: memref<16x32xf32, #tpu.memory_space<vmem>>, %arg4: memref<1x32xf32, #tpu.memory_space<vmem>>, %arg5: memref<2x17x32xf32, #tpu.memory_space<vmem>>) attributes {dimension_semantics = [#tpu.dimension_semantics<parallel>], iteration_bounds = array<i64: 2>, scalar_prefetch = 0 : i64, scratch_operands = 0 : i64, tpu.core_type = #tpu.core_type<tc>, window_params = [{transform_indices = @transform_0, window_bounds = array<i64: 2, 16, 64>}, {pipeline_mode = #tpu.pipeline_mode<synchronous>, transform_indices = @transform_1, window_bounds = array<i64: 64, 32>}, {pipeline_mode = #tpu.pipeline_mode<synchronous>, transform_indices = @transform_2, window_bounds = array<i64: 16, 32>}, {pipeline_mode = #tpu.pipeline_mode<synchronous>, transform_indices = @transform_3, window_bounds = array<i64: 1, 32>}, {transform_indices = @transform_4, window_bounds = array<i64: 2, 17, 32>}]} {
    %c0 = arith.constant 0 : index
    %c0_0 = arith.constant 0 : index
    %c0_1 = arith.constant 0 : index
    %0 = vector.load %arg1[%c0, %c0_0, %c0_1] : memref<2x16x64xbf16, #tpu.memory_space<vmem>>, vector<2x16x64xbf16>
    %1 = vector.shape_cast %0 : vector<2x16x64xbf16> to vector<32x64xbf16>
    %c0_2 = arith.constant 0 : index
    %c0_3 = arith.constant 0 : index
    %2 = vector.load %arg2[%c0_2, %c0_3] : memref<64x32xbf16, #tpu.memory_space<vmem>>, vector<64x32xbf16>
    %cst = arith.constant dense<0.000000e+00> : vector<32x32xf32>
    %3 = tpu.matmul %1, %2, %cst {dimension_numbers = #tpu.dot_dimension_numbers<[1], [0], [0], [1], [0, 0, 1, 1], [], []>} : vector<32x64xbf16>, vector<64x32xbf16>, vector<32x32xf32> -> vector<32x32xf32>
    %4 = vector.shape_cast %3 : vector<32x32xf32> to vector<2x16x32xf32>
    %c0_4 = arith.constant 0 : index
    %c0_5 = arith.constant 0 : index
    %5 = vector.load %arg4[%c0_4, %c0_5] : memref<1x32xf32, #tpu.memory_space<vmem>>, vector<1x32xf32>
    %6 = vector.shape_cast %5 : vector<1x32xf32> to vector<1x1x32xf32>
    %7 = vector.broadcast %6 : vector<1x1x32xf32> to vector<2x1x32xf32>
    %c0_6 = arith.constant 0 : index
    %c0_7 = arith.constant 0 : index
    %c0_8 = arith.constant 0 : index
    %8 = vector.load %arg5[%c0_6, %c0_7, %c0_8] : memref<2x17x32xf32, #tpu.memory_space<vmem>>, vector<2x1x32xf32>
    tpu.vector_store %arg5[%c0_6, %c0_7, %c0_8], %7 {strides = array<i32>} : memref<2x17x32xf32, #tpu.memory_space<vmem>>, vector<2x1x32xf32>,
    %c0_9 = arith.constant 0 : index
    %c0_10 = arith.constant 0 : index
    %9 = vector.load %arg3[%c0_9, %c0_10] : memref<16x32xf32, #tpu.memory_space<vmem>>, vector<16x32xf32>
    %10 = vector.shape_cast %9 : vector<16x32xf32> to vector<1x16x32xf32>
    %11 = vector.broadcast %10 : vector<1x16x32xf32> to vector<2x16x32xf32>
    %12 = arith.addf %4, %11 : vector<2x16x32xf32>
    %c0_11 = arith.constant 0 : index
    %c1 = arith.constant 1 : index
    %c0_12 = arith.constant 0 : index
    %13 = vector.load %arg5[%c0_11, %c1, %c0_12] : memref<2x17x32xf32, #tpu.memory_space<vmem>>, vector<2x16x32xf32>
    tpu.vector_store %arg5[%c0_11, %c1, %c0_12], %12 {strides = array<i32>} : memref<2x17x32xf32, #tpu.memory_space<vmem>>, vector<2x16x32xf32>,
    return
  }
  func.func @transform_0(%arg0: i32) -> (i32, i32, i32) {
    %c0_i32 = arith.constant 0 : i32
    %c0_i32_0 = arith.constant 0 : i32
    %c0_i32_1 = arith.constant 0 : i32
    return %arg0, %c0_i32, %c0_i32_0 : i32, i32, i32
  }
  func.func @transform_1(%arg0: i32) -> (i32, i32) {
    %c0_i32 = arith.constant 0 : i32
    %c0_i32_0 = arith.constant 0 : i32
    %c0_i32_1 = arith.constant 0 : i32
    return %c0_i32, %c0_i32_0 : i32, i32
  }
  func.func @transform_2(%arg0: i32) -> (i32, i32) {
    %c0_i32 = arith.constant 0 : i32
    %c0_i32_0 = arith.constant 0 : i32
    %c0_i32_1 = arith.constant 0 : i32
    return %c0_i32, %c0_i32_0 : i32, i32
  }
  func.func @transform_3(%arg0: i32) -> (i32, i32) {
    %c0_i32 = arith.constant 0 : i32
    %c0_i32_0 = arith.constant 0 : i32
    %c0_i32_1 = arith.constant 0 : i32
    return %c0_i32, %c0_i32_0 : i32, i32
  }
  func.func @transform_4(%arg0: i32) -> (i32, i32, i32) {
    %c0_i32 = arith.constant 0 : i32
    %c0_i32_0 = arith.constant 0 : i32
    %c0_i32_1 = arith.constant 0 : i32
    return %arg0, %c0_i32, %c0_i32_0 : i32, i32, i32
  }
}

</mosaic_0001>

<bundles_post_ra>
// kernel: patch_embedding_forward.1
= control target key start
LH: loop header
LB: loop body
LE: loop exit
PB: predicated region body
PF: predicated region fallthrough
CT: control target
= control target key end

     0   :  { %s469_s15 = smov 0   ;;  %s507_s0 = inlined_call_operand.vmem [shape: bf16[4,16,64], index: 0, kind: input, shape index: {}]   ;;  %s508_s1 = inlined_call_operand.vmem [shape: bf16[64,32], index: 1, kind: input, shape index: {}]   ;;  %s509_s2 = inlined_call_operand.vmem [shape: f32[16,32], index: 2, kind: input, shape index: {}]   ;;  %s510_s3 = inlined_call_operand.vmem [shape: f32[1,32], index: 3, kind: input, shape index: {}]   ;;  %s511_s4 = inlined_call_operand.vmem [shape: f32[4,17,32], index: 4, kind: output, shape index: {}]  }
   0x1 LB: > { %s382_s16 = sadd.s32 4294967295, %s442_s15   ;;  %p386_p0 = scmp.ge.s32.totalorder %s442_s15, 1  ;;  %s442_s15 = sphi %s469_s15, %s14_s15  }
   0x2   : > { %p164_p1 = scmp.lt.s32.totalorder %s442_s15, 3 }
   0x4   : > { %p165_p2 = pnand %p386_p0, %p164_p1 }
   0x5   : > { %v430_v0 = vld [vmem:[%s508_s1] sm:$0xff] (!%p165_p2)   ;;  %s387_s19 = sshll.u32 (!%p165_p2), %s382_s16, 1  ;;  %v431_v1 = vld [vmem:[%s508_s1 + $0x8] sm:$0xff] (!%p165_p2)   ;;  %v432_v2 = vld [vmem:[%s508_s1 + $0x10] sm:$0xff] (!%p165_p2)   ;;  %vm310_vm0 = vcmask (!%p165_p2), 253952   ;;  %vm253_vm1 = vcmask (!%p165_p2), 523264  }
   0x6   : > { %168 = sbr.rel (%p165_p2) target bundleno = 240 (0xf0), region = 36  ;;  %p193_p3 = scmp.lt.s32.totalorder (!%p165_p2), %s387_s19, 3  ;;  %409 = vmatprep.subr.bf16.mxu0 (!%p165_p2), %v430_v0  ;;  %v309_v3 = vld [vmem:[%s510_s3] sm:$0x1] (!%p165_p2)  ;;  %v433_v5 = vld [vmem:[%s508_s1 + $0x18] sm:$0xff] (!%p165_p2)   ;;  %vm319_vm2 = vcmask (!%p165_p2), 261120  }
   0x7   : > { %410 = vmatpush3.bf16.msra.mxu0 (!%p165_p2), %v430_v0  ;;  %v313_v7 = vld [vmem:[%s509_s2] sm:$0xff] (!%p165_p2)  ;;  %v314_v10 = vld [vmem:[%s509_s2 + $0x8] sm:$0xff] (!%p165_p2) }
   0x8   : > { %411 = vmatprep.subr.bf16.mxu0 (!%p165_p2), %v431_v1 }
   0xb   : > { %412 = vmatpush3.bf16.msra.mxu0 (!%p165_p2), %v431_v1 }
   0xc   : > { %413 = vmatprep.subr.bf16.mxu0 (!%p165_p2), %v432_v2 }
   0xd   : > { %s513_s19 = smov (!%p193_p3, %s387_s19), 3 }
   0xe   : > { %s402_s24 = sshll.u32 %s513_s19, 3  ;;  %s421_s25 = smul.u32 24, %s513_s19 }
   0xf   : > { %s197_s30 = scalar_lea.vmem %s507_s0, %s402_s24  ;;  %414 = vmatpush3.bf16.msra.mxu0 %v432_v2 }
  0x10   : > { %s204_s7 = scalar_lea.vmem %s511_s4, %s421_s25  ;;  %v434_v4 = vld [vmem:[%s197_s30] sm:$0xff]   ;;  %415 = vmatprep.subr.bf16.mxu0 %v433_v5  ;;  %v435_v6 = vld [vmem:[%s197_s30 + $0x8] sm:$0xff]  }
  0x11   : > { %311 = vst.msk [vmem:[%s204_s7] sm:$0x1] %vm310_vm0, %v309_v3  ;;  %417 = vmatprep.mubr.msk.bf16.mxu0 %vm253_vm1, %v434_v4  ;;  %312 = vst.msk [vmem:[%s204_s7 + $0x18] sm:$0x1] %vm310_vm0, %v309_v3 }
  0x13   : > { %416 = vmatpush3.bf16.msra.mxu0 %v433_v5 }
  0x16   : > { %418 = vmatmul.mubr.msk.bf16.vlgmr.msra.gmra.mrb[0].mxu0 %vm253_vm1, %v435_v6 }
  0xe9   : > { %v419_v8 = vpop.f32.mrb[0].mxu0 }
  0xea   : > { %v294_v9 = vpop.f32.mrb[1].mxu0  ;;  %v317_v13 = vadd.f32 %v419_v8, %v313_v7 }
  0xeb   : > { %v315_v11 = vadd.f32 %v313_v7, %v294_v9  ;;  %v420_v12 = vpop.f32.mrb[2].mxu0 }
  0xec   : > { %v297_v14 = vpop.f32.mrb[3].mxu0  ;;  %322 = vst.msk [vmem:[%s204_s7 + $0x19] sm:$0xff] %vm319_vm2, %v317_v13  ;;  %v318_v16 = vadd.f32 %v420_v12, %v314_v10 }
  0xed   : > { %320 = vst.msk [vmem:[%s204_s7 + $0x1] sm:$0xff] %vm319_vm2, %v315_v11  ;;  %v316_v15 = vadd.f32 %v314_v10, %v297_v14 }
  0xee   : > { %323 = vst.msk [vmem:[%s204_s7 + $0x21] sm:$0xff] %vm319_vm2, %v318_v16 }
  0xef   : > { %321 = vst.msk [vmem:[%s204_s7 + $0x9] sm:$0xff] %vm319_vm2, %v316_v15 }
  0xf0 PF: > { %s14_s15 = sadd.s32 1, %s442_s15  }
  0xf1   : > { %p11_p4 = scmp.ge.s32.totalorder %s14_s15, 4  }
  0xf3   :  { %13 = sbr.rel (!%p11_p4) target bundleno = 1 (0x1), region = 66 }

</bundles_post_ra>
